<compile_context>
chip_gen: v5e
topology: v5e:2x2
jax: 0.10.0
libtpu: 0.0.40
codegen_flags: <defaults>
</compile_context>

<pallas_src>
import jax
import jax.numpy as jnp
from jax.experimental import pallas as pl
from jax.experimental.pallas import tpu as pltpu


def output_linear_kernel(x_ref, w_ref, b_ref, o_ref):
    # MXU matmul: bf16 inputs, f32 accumulation.
    z = jnp.dot(x_ref[...], w_ref[...], preferred_element_type=jnp.float32)
    z = z + b_ref[...]                       # (B, tn) + (1, tn) bias
    # Sigmoid epilogue in f32: exp on EUP, one divide — lane-dense store.
    y = 1.0 / (1.0 + jnp.exp(-z))
    o_ref[...] = y.astype(o_ref.dtype)


def output_linear(x, w, b, *, tn=128):
    """x: (B, D_in) f32, w: (D_in, D_out) f32, b: (D_out,) f32 -> (B, D_out) f32."""
    B, D_in = x.shape
    D_out = w.shape[1]

    # Pad the feature dim to a lane-dense multiple of 128 so output stores are
    # unmasked; slice the padding off after the call.
    n_tiles = pl.cdiv(D_out, tn)
    D_pad = n_tiles * tn
    if D_pad != D_out:
        w = jnp.pad(w, ((0, 0), (0, D_pad - D_out)))
        b = jnp.pad(b, (0, D_pad - D_out))
    b2 = b.reshape(1, D_pad).astype(jnp.float32)

    # bf16 operands for the MXU (accumulation stays f32 inside the kernel).
    x_bf = x.astype(jnp.bfloat16)
    w_bf = w.astype(jnp.bfloat16)

    out = pl.pallas_call(
        output_linear_kernel,
        out_shape=jax.ShapeDtypeStruct((B, D_pad), jnp.float32),
        grid=(n_tiles,),
        in_specs=[
            pl.BlockSpec((B, D_in), lambda j: (0, 0)),     # x: resident, reused per tile
            pl.BlockSpec((D_in, tn), lambda j: (0, j)),    # W feature tile (pipelined)
            pl.BlockSpec((1, tn), lambda j: (0, j)),       # bias feature tile
        ],
        out_specs=pl.BlockSpec((B, tn), lambda j: (0, j)),
        compiler_params=pltpu.CompilerParams(
            dimension_semantics=("parallel",),             # independent D_out tiles
            vmem_limit_bytes=32 * 1024 * 1024,             # fits v7x's smaller VMEM
        ),
    )(x_bf, w_bf, b2)

    return out[:, :D_out]


if __name__ == "__main__":
    # Small shapes consistent with the module: batch=8, input_len=32, output_len=256
    # (256 is a multiple of 128 -> lane-dense output, 2 feature tiles in the grid).
    B, D_in, D_out = 8, 32, 256
    key = jax.random.PRNGKey(0)
    kx, kw, kb = jax.random.split(key, 3)

    x = jax.random.normal(kx, (B, D_in), dtype=jnp.float32)

    # nn.Linear default init: U(-1/sqrt(in), 1/sqrt(in)); stored here as (D_in, D_out).
    bound = 1.0 / jnp.sqrt(jnp.float32(D_in))
    w = jax.random.uniform(kw, (D_in, D_out), jnp.float32, -bound, bound)
    b = jax.random.uniform(kb, (D_out,), jnp.float32, -bound, bound)

    out = output_linear(x, w, b)
    jax.block_until_ready(out)

    # Reference 1: same bf16 operand rounding as the kernel (tight tolerance).
    z_bf = jnp.dot(x.astype(jnp.bfloat16), w.astype(jnp.bfloat16),
                   preferred_element_type=jnp.float32) + b
    ref_bf = 1.0 / (1.0 + jnp.exp(-z_bf))
    assert jnp.allclose(out, ref_bf, atol=1e-4, rtol=1e-4)

    # Reference 2: full-f32 math (loose tolerance covers the bf16 input cast).
    ref_f32 = 1.0 / (1.0 + jnp.exp(-(x @ w + b)))
    assert jnp.allclose(out, ref_f32, atol=2e-2, rtol=2e-2)

    print("KERNEL_OK")
</pallas_src>

<mosaic_0001>
module attributes {stable_mosaic.version = 11 : i64} {
  func.func @output_linear_kernel(%arg0: i32, %arg1: memref<8x32xbf16, #tpu.memory_space<vmem>>, %arg2: memref<32x128xbf16, #tpu.memory_space<vmem>>, %arg3: memref<1x128xf32, #tpu.memory_space<vmem>>, %arg4: memref<8x128xf32, #tpu.memory_space<vmem>>) attributes {dimension_semantics = [#tpu.dimension_semantics<parallel>], iteration_bounds = array<i64: 2>, scalar_prefetch = 0 : i64, scratch_operands = 0 : i64, tpu.core_type = #tpu.core_type<tc>, window_params = [{pipeline_mode = #tpu.pipeline_mode<synchronous>, transform_indices = @transform_0, window_bounds = array<i64: 8, 32>}, {transform_indices = @transform_1, window_bounds = array<i64: 32, 128>}, {transform_indices = @transform_2, window_bounds = array<i64: 1, 128>}, {transform_indices = @transform_3, window_bounds = array<i64: 8, 128>}]} {
    %c0 = arith.constant 0 : index
    %c0_0 = arith.constant 0 : index
    %0 = vector.load %arg1[%c0, %c0_0] : memref<8x32xbf16, #tpu.memory_space<vmem>>, vector<8x32xbf16>
    %c0_1 = arith.constant 0 : index
    %c0_2 = arith.constant 0 : index
    %1 = vector.load %arg2[%c0_1, %c0_2] : memref<32x128xbf16, #tpu.memory_space<vmem>>, vector<32x128xbf16>
    %cst = arith.constant dense<0.000000e+00> : vector<8x128xf32>
    %2 = tpu.matmul %0, %1, %cst {dimension_numbers = #tpu.dot_dimension_numbers<[1], [0], [0], [1], [0, 0, 1, 1], [], []>} : vector<8x32xbf16>, vector<32x128xbf16>, vector<8x128xf32> -> vector<8x128xf32>
    %c0_3 = arith.constant 0 : index
    %c0_4 = arith.constant 0 : index
    %3 = vector.load %arg3[%c0_3, %c0_4] : memref<1x128xf32, #tpu.memory_space<vmem>>, vector<1x128xf32>
    %4 = vector.broadcast %3 : vector<1x128xf32> to vector<8x128xf32>
    %5 = arith.addf %2, %4 : vector<8x128xf32>
    %cst_5 = arith.constant 0.000000e+00 : f32
    %6 = vector.broadcast %cst_5 : f32 to vector<8x128xf32>
    %7 = arith.subf %6, %5 : vector<8x128xf32>
    %8 = math.exp %7 : vector<8x128xf32>
    %cst_6 = arith.constant 1.000000e+00 : f32
    %9 = vector.broadcast %cst_6 : f32 to vector<8x128xf32>
    %10 = arith.addf %9, %8 : vector<8x128xf32>
    %cst_7 = arith.constant 1.000000e+00 : f32
    %11 = vector.broadcast %cst_7 : f32 to vector<8x128xf32>
    %12 = arith.divf %11, %10 : vector<8x128xf32>
    %c0_8 = arith.constant 0 : index
    %c0_9 = arith.constant 0 : index
    %13 = vector.load %arg4[%c0_8, %c0_9] : memref<8x128xf32, #tpu.memory_space<vmem>>, vector<8x128xf32>
    tpu.vector_store %arg4[%c0_8, %c0_9], %12 {strides = array<i32>} : memref<8x128xf32, #tpu.memory_space<vmem>>, vector<8x128xf32>,
    return
  }
  func.func @transform_0(%arg0: i32) -> (i32, i32) {
    %c0_i32 = arith.constant 0 : i32
    %c0_i32_0 = arith.constant 0 : i32
    %c0_i32_1 = arith.constant 0 : i32
    return %c0_i32, %c0_i32_0 : i32, i32
  }
  func.func @transform_1(%arg0: i32) -> (i32, i32) {
    %c0_i32 = arith.constant 0 : i32
    %c0_i32_0 = arith.constant 0 : i32
    return %c0_i32, %arg0 : i32, i32
  }
  func.func @transform_2(%arg0: i32) -> (i32, i32) {
    %c0_i32 = arith.constant 0 : i32
    %c0_i32_0 = arith.constant 0 : i32
    return %c0_i32, %arg0 : i32, i32
  }
  func.func @transform_3(%arg0: i32) -> (i32, i32) {
    %c0_i32 = arith.constant 0 : i32
    %c0_i32_0 = arith.constant 0 : i32
    return %c0_i32, %arg0 : i32, i32
  }
}

</mosaic_0001>

<bundles_post_ra>
// kernel: tpu_custom_call.1
= control target key start
LH: loop header
LB: loop body
LE: loop exit
PB: predicated region body
PF: predicated region fallthrough
CT: control target
= control target key end

     0   :  { %8 = vsyncpa [#allocation3], 0  ;;  %s864_s0 = inlined_call_operand.hbm [shape: bf16[8,32], index: 0, kind: input, shape index: {}]   ;;  %s865_s1 = inlined_call_operand.hbm [shape: bf16[32,256], index: 1, kind: input, shape index: {}]   ;;  %s866_s2 = inlined_call_operand.hbm [shape: f32[1,256], index: 2, kind: input, shape index: {}]   ;;  %s867_s3 = inlined_call_operand.hbm [shape: f32[8,256], index: 3, kind: output, shape index: {}]  }
   0x1   :  { %9 = vsyncpa [#allocation6], 0 }
   0x2   :  { %11 = vsyncpa [#allocation6 + $0x1], 0 }
   0x3   :  { %12 = vsyncpa [#allocation4], 0 }
   0x4   :  { %14 = vsyncpa [#allocation4 + $0x1], 0  ;;  %s691_s12 = smov 0   ;;  %s693_s13 = smov 0  }
   0x5   :  { %s695_s14 = smov 0   ;;  %s697_s15 = smov 0  }
   0x6 LB: > { %s712_s16 = sadd.s32 1, %s665_s15   ;;  %s48_s17 = sadd.s32 1, %s661_s14  ;;  %s665_s15 = sphi %s697_s15, %s880_s15   ;;  %s661_s14 = sphi %s695_s14, %s879_s14   ;;  %s657_s13 = sphi %s693_s13, %s878_s13   ;;  %s653_s12 = sphi %s691_s12, %s877_s12  }
   0x7   : > { %s45_s18 = ssub.s32 %s665_s15, %s712_s16  ;;  %p55_p0 = scmp.ne.s32.totalorder %s661_s14, %s657_s13 }
   0x8   : > { %p46_p1 = scmp.eq.s32.totalorder %s45_s18, 0  ;;  %p56_p2 = scmp.eq.s32.totalorder %s665_s15, 0 }
   0x9   : > { %p461_p4 = scmp.lt.s32.totalorder %s665_s15, 2  ;;  %s149_s20 = sand.u32 1, %s665_s15  }
   0xa   : > { %s723_s19 = scalar_select %p46_p1, %s661_s14, %s48_s17  }
   0xb   : > { %p57_p5 = por %p56_p2, %p55_p0  ;;  %s151_s21 = sand.u32 1, %s661_s14  }
   0xc   : > { %s414_s22 = sshll.u32 %s151_s21, 4  ;;  %s415_s23 = sshll.u32 %s665_s15, 2 }
   0xd   : > { %s157_s26 = scalar_lea.hbm %s865_s1, %s415_s23  ;;  %s153_s28 = scalar_lea.vmem [#allocation5], %s414_s22 }
   0xe   : > { %s158_s27 = sshll.u32 %s157_s26, 4  ;;  %s160_s29 = sshll.u32 %s153_s28, 4  ;;  %s159_s27 = int_to_ptr.hbm [resolvable:$true] %s158_s27  ;;  %s161_s29 = int_to_ptr.vmem [resolvable:$true] %s160_s29 }
   0xf   : > { %p738_p6 = pnand %p461_p4, %p57_p5  ;;  %s742_s4 = scalar_lea.sflag [#allocation6], %s149_s20 }
  0x10   : > { %s505_s5 = sshra.s32 %s159_s27, 4  ;;  %s512_s9 = scalar_lea.hbm %s865_s1, 32  ;;  %s506_s5 = int_to_ptr.hbm [resolvable:$true] %s505_s5 }
  0x11   : > { %s507_s6 = scalar_lea.hbm %s506_s5, 16  ;;  %p509_p8 = pneg %p738_p6 }
  0x12   : > { %p508_p7 = scmp.ne.s32.totalorder %s506_s5, %s507_s6  ;;  %p513_p11 = scmp.lt.s32.totalorder %s506_s5, %s865_s1 }
  0x13   : > { %p514_p12 = scmp.lt.s32.totalorder %s512_s9, %s507_s6 }
  0x14   : > { %p510_p9 = pnand %p509_p8, %p508_p7 }
  0x15   : > { %p515_p13 = por %p514_p12, %p513_p11 }
  0x16   : > { %p511_p10 = pneg %p510_p9 }
  0x18   : > { %p516_p1 = pnand %p515_p13, %p511_p10 }
  0x1a   : > { %519 = shalt.err (!%p516_p1)
}
  0x1b   : > { %s667_s17 = smov 128   ;;  %s668_s18 = smov 64  }
  0x1c   : > { %s669_s20 = smov 4   ;;  %s759_s22 = sadd.s32 4294967295, %s665_s15  }
  0x1d   : > { %452 = dma.hbm_to_vmem [thread:$0]  (!%p738_p6), %s159_s27, 256, %s161_s29, %s742_s4, %s667_s17, %s668_s18, %s669_s20  }
  0x1e   : > { %s410_s23 = sadd.s32 4294967294, %s665_s15   ;;  %p61_p2 = scmp.ne.s32.totalorder %s657_s13, %s653_s12 }
  0x1f   : > { %p868_p4 = scmp.eq.s32.totalorder %s759_s22, 0  ;;  %p111_p5 = scmp.eq.s32.totalorder %s759_s22, 1 }
  0x20   : > { %p117_p7 = scmp.eq.s32.totalorder %s410_s23, 1  ;;  %p411_p9 = scmp.ge.s32.totalorder %s665_s15, 1 }
  0x21   : > { %p769_p10 = por %p868_p4, %p61_p2  ;;  %p776_p11 = por %p111_p5, %p55_p0 }
  0x22   : > { %p780_p12 = por %p117_p7, %p61_p2  ;;  %p124_p13 = scmp.lt.s32.totalorder %s665_s15, 3 }
  0x23   : > { %s136_s29 = sshll.u32 %s864_s0, 4  ;;  %s670_s6 = smov [#allocation2]   ;;  %s137_s29 = int_to_ptr.hbm [resolvable:$true] %s136_s29 }
  0x24   : > { %p788_p1 = pnand %p411_p9, %p124_p13  ;;  %s138_s7 = sshll.u32 %s670_s6, 4  ;;  %s139_s7 = int_to_ptr.vmem [resolvable:$true] %s138_s7 }
  0x25   : > { %s176_s10 = scalar_lea.hbm %s866_s2, %s665_s15  ;;  %s173_s17 = scalar_lea.vmem [#allocation7], %s151_s21 }
  0x26   : > { %p445_p0 = pneg %p788_p1  ;;  %s178_s11 = sshll.u32 %s176_s10, 4  ;;  %s179_s11 = int_to_ptr.hbm [resolvable:$true] %s178_s11 }
  0x27   : > { %s180_s18 = sshll.u32 %s173_s17, 4  ;;  %s565_s20 = sshra.s32 %s179_s11, 4  ;;  %s181_s18 = int_to_ptr.vmem [resolvable:$true] %s180_s18  ;;  %s566_s20 = int_to_ptr.hbm [resolvable:$true] %s565_s20 }
  0x28   : > { %p446_p2 = pnand %p445_p0, %p868_p4  ;;  %s567_s23 = scalar_lea.hbm %s566_s20, 1 }
  0x29   : > { %p568_p5 = scmp.ne.s32.totalorder %s566_s20, %s567_s23  ;;  %s572_s6 = scalar_lea.hbm %s866_s2, 2 }
  0x2a   : > { %448 = dma.hbm_to_vmem [thread:$0]  (!%p446_p2), %s137_s29, 64, %s139_s7, [#allocation3]  }
  0x2b   : > { %p570_p7 = pnand %p568_p5, %p509_p8  ;;  %p573_p13 = scmp.lt.s32.totalorder %s566_s20, %s866_s2 }
  0x2c   : > { %p574_p0 = scmp.lt.s32.totalorder %s572_s6, %s567_s23 }
  0x2d   : > { %p571_p9 = pneg %p570_p7 }
  0x2e   : > { %p575_p3 = por %p574_p0, %p573_p13 }
  0x30   : > { %p576_p4 = pnand %p575_p3, %p571_p9 }
  0x32   : > { %579 = shalt.err (!%p576_p4)
}
  0x33   : > { %455 = dma.hbm_to_vmem [thread:$0]  (!%p738_p6), %s179_s11, 16, %s181_s18, %s742_s4  }
  0x34   : > { %189 = sbr.rel (%p788_p1) target bundleno = 231 (0xe7), region = 32  ;;  %p874_p8 = scmp.eq.s32.totalorder (!%p788_p1), %s759_s22, 0 }
  0x39   : > { %640 = dma.done.wait (%p874_p8), [#allocation3], 64   ;;  %p875_p2 = pmov %p874_p8 }
  0x3a   : > { %s196_s21 = sand.u32 1, %s759_s22   ;;  %s822_s29 = sand.u32 1, %s657_s13  }
  0x3b   : > { %642 = vsyncadd (%p875_p2), [#allocation3], 4294967232  ;;  %s418_s7 = sshll.u32 %s822_s29, 4  ;;  %s197_s30 = scalar_lea.sflag [#allocation6], %s196_s21 }
  0x3c   : > { %s200_s10 = scalar_lea.vmem [#allocation5], %s418_s7 }
  0x3d   : > { %644 = dma.done.wait (%p769_p10), %s197_s30, 272  }
  0x3e   : > { %646 = vsyncadd (%p769_p10), %s197_s30, 4294967024  ;;  %v434_v0 = vld [vmem:[%s200_s10 + $0x8] sm:$0xff]  ;;  %s209_s4 = scalar_lea.vmem [#allocation7], %s822_s29  ;;  %v433_v1 = vld [vmem:[%s200_s10] sm:$0xff]  ;;  %vm259_vm0 = vcmask 261120   ;;  %s419_s24 = sshll.u32 %s822_s29, 3 }
  0x3f   : > { %269 = vmatpush.bf16.msra.mxu0 %v434_v0  ;;  %v238_v2 = vld [vmem:[#allocation2] sm:$0xf]  ;;  %s430_s5 = sshll.u32 %s759_s22, 3  ;;  %s236_s20 = scalar_lea.vmem [#allocation8], %s419_s24 }
  0x40   : > { %v500_v3 = vld [vmem:[%s209_s4] ss:$0 sm:$0xff]  ;;  %s307_s18 = scalar_lea.hbm %s867_s3, %s430_s5  ;;  %s309_s23 = sshll.u32 %s236_s20, 4  ;;  %s310_s23 = int_to_ptr.vmem [resolvable:$true] %s309_s23 }
  0x41   : > { %s311_s27 = sshll.u32 %s307_s18, 4  ;;  %s297_s22 = scalar_lea.sflag [#allocation4], %s822_s29  ;;  %s312_s27 = int_to_ptr.hbm [resolvable:$true] %s311_s27 }
  0x42   : > { %s609_s28 = sshra.s32 %s312_s27, 4  ;;  %s615_s21 = scalar_lea.hbm %s867_s3, 16  ;;  %s610_s28 = int_to_ptr.hbm [resolvable:$true] %s609_s28 }
  0x43   : > { %270 = vmatpush.bf16.msra.mxu0 %v433_v1  ;;  %s611_s6 = scalar_lea.hbm %s610_s28, 8  ;;  %p616_p10 = scmp.lt.s32.totalorder %s610_s28, %s867_s3 }
  0x44   : > { %p612_p3 = scmp.ne.s32.totalorder %s610_s28, %s611_s6  ;;  %p617_p1 = scmp.lt.s32.totalorder %s615_s21, %s611_s6 }
  0x46   : > { %428 = vmatmul.msk.bf16.vlgmr.msra.gmra.mxu0 %vm259_vm0, %v238_v2  ;;  %p613_p6 = pnand %p612_p3, %p776_p11  ;;  %p618_p5 = por %p617_p1, %p616_p10 }
  0x48   : > { %p614_p4 = pneg %p613_p6 }
  0x4a   : > { %p619_p7 = pnand %p618_p5, %p614_p4 }
  0xc3   : > { %v272_v4 = vpop.f32.mrf.mxu0 }
  0xc4   : > { %v273_v5 = vadd.f32 %v500_v3, %v272_v4 }
  0xc6   : > { %v276_v6 = vsub.f32 0.0, %v273_v5 }
  0xc8   : > { %v277_v7 = vmul.f32 1.442695, %v276_v6 }
  0xca   : > { %501 = vpow2.f32 %v277_v7 }
  0xcb   : > { %v274_v8 = vpop.f32.mrf.mxu0 }
  0xd0   : > { %v502_v9 = vpop.eup %501 }
  0xd1   : > { %v279_v10 = vadd.f32 1.0, %v502_v9 }
  0xd3   : > { %503 = vrcp.f32 %v279_v10  ;;  %v291_v14 = vand.u32 2147483648, %v279_v10  ;;  %v289_v16 = vand.u32 2147483647, %v279_v10  ;;  %vm285_vm2 = vweird.f32 %v279_v10 }
  0xd5   : > { %v292_v18 = vor.u32 1.1754944e-38, %v291_v14  ;;  %vm290_vm4 = vcmp.eq.f32.partialorder %v289_v16, 8.507059e+37 }
  0xd9   : > { %v504_v11 = vpop.eup %503 }
  0xda   : > { %v281_v12 = vmul.f32 %v504_v11, %v279_v10  ;;  %vm286_vm1 = vweird.f32 %v504_v11 }
  0xdb   : > { %vm287_vm3 = vmor %vm285_vm2, %vm286_vm1 }
  0xdc   : > { %v282_v13 = vsub.f32 1.0, %v281_v12 }
  0xde   : > { %v283_v15 = vmul.f32 %v504_v11, %v282_v13 }
  0xe0   : > { %v284_v17 = vadd.f32 %v504_v11, %v283_v15 }
  0xe2   : > { %v288_v19 = vsel %vm287_vm3, %v504_v11, %v284_v17 }
  0xe3   : > { %v293_v20 = vsel %vm290_vm4, %v292_v18, %v288_v19 }
  0xe4   : > { %295 = vst [vmem:[%s236_s20] sm:$0xff] %v293_v20 }
  0xe5   : > { %622 = shalt.err (!%p619_p7)
}
  0xe6   : > { %443 = dma.vmem_to_hbm [thread:$0]  (%p776_p11), %s310_s23, 128, %s312_s27, %s297_s22  }
  0xe7 PF: > { %s323_s29 = sand.u32 1, %s653_s12   ;;  %p876_p9 = scmp.ge.s32.totalorder %s665_s15, 2 }
  0xe8   : > { %s324_s10 = scalar_lea.sflag [#allocation4], %s323_s29 }
  0xe9   : > { %p457_p13 = pnand %p876_p9, %p780_p12 }
  0xeb   : > { %p458_p0 = pneg %p457_p13 }
  0xed   : > { %648 = dma.done.wait (%p458_p0), %s324_s10, 128  }
  0xee   : > { %650 = vsyncadd (%p458_p0), %s324_s10, 4294967168  ;;  %p17_p8 = scmp.ge.s32.totalorder %s712_s16, 4   ;;  %s877_s12 = smov %s657_s13 }
  0xef   : > { %s878_s13 = smov %s661_s14  ;;  %s879_s14 = smov %s723_s19 }
  0xf0   : > { %s880_s15 = smov %s712_s16  ;;  %19 = sbr.rel (!%p17_p8) target bundleno = 6 (0x6), region = 93 }
  0xf5   :  { %330 = vsyncpa [#allocation3], 1 }
  0xf6   :  { %332 = vsyncpa [#allocation3 + $0x1], 1 }
  0xf7   :  { %333 = vsyncpa [#allocation6], 1 }
  0xf8   :  { %335 = vsyncpa [#allocation6 + $0x1], 1 }
  0xf9   :  { %336 = vsyncpa [#allocation4], 1 }
  0xfa   :  { %338 = vsyncpa [#allocation4 + $0x1], 1 }

</bundles_post_ra>
